<compile_context>
chip_gen: v7x
topology: tpu7x:2x2x1
jax: 0.10.0
libtpu: 0.0.40
codegen_flags: <defaults>
</compile_context>

<pallas_src>
import functools

import jax
import jax.numpy as jnp
from jax.experimental import pallas as pl
from jax.experimental.pallas import tpu as pltpu

_EPS = 1e-5


# ---------------------------------- kernel -----------------------------------

def _basic_block_kernel(inv_cnt,
                        x_ref, nt_ref, nb_ref,
                        m1_ref, g1_ref, b1_ref,
                        m2_ref, g2_ref, b2_ref,
                        a_ref, out_ref):
    """out = relu(bn2(conv2(relu(bn1(conv1(x))))) + x), all in VMEM, f32.

    x_ref:   (N*H, W*C)   lane-dense flat activations (rows are (n, h)).
    nt/nb:   (N*H, W*C)   0/1 masks: 0 on rows with h==0 / h==H-1 (image
                          boundary in H -> the shifted row-tap must be zero).
    m*_ref:  (3, W*C, W*C) banded per-kh conv matrices (kw + W zero-padding
                          folded in, built host-side).
    g*/b*:   (1, W*C)     gamma/beta tiled per lane.
    a_ref:   (W*C, W*C)   0/1 matrix, a[i, j] = (i % C == j % C); y @ a gives
                          per-row channel-class sums (per-channel BN stats
                          without strided lane reductions or reshapes).
    """
    x = x_ref[...]
    nt = nt_ref[...]
    nb = nb_ref[...]
    a = a_ref[...]

    def conv3x3(z, m_ref):
        # Row taps: kh=0 needs input row h-1, kh=2 needs row h+1.  Built with
        # a one-row shift (slice + concat of a zero row) and a boundary-mask
        # multiply — no padded scratch, no full-tensor zeroing.
        zero_row = jnp.zeros_like(z[:1, :])
        above = jnp.concatenate([zero_row, z[:-1, :]], axis=0) * nt   # row h-1
        below = jnp.concatenate([z[1:, :], zero_row], axis=0) * nb    # row h+1
        y = jnp.dot(above, m_ref[0], preferred_element_type=jnp.float32)
        y = y + jnp.dot(z, m_ref[1], preferred_element_type=jnp.float32)
        y = y + jnp.dot(below, m_ref[2], preferred_element_type=jnp.float32)
        return y

    def bn_fold(y, gamma, beta):
        # One-pass batch stats (sum, sum-of-squares) + BN folded into a
        # single per-lane scale/shift FMA.  All f32.
        s = jnp.sum(jnp.dot(y, a, preferred_element_type=jnp.float32),
                    axis=0, keepdims=True)                 # per-channel sums
        q = jnp.sum(jnp.dot(y * y, a, preferred_element_type=jnp.float32),
                    axis=0, keepdims=True)                 # per-channel sumsq
        mean = s * inv_cnt
        var = q * inv_cnt - mean * mean                    # biased variance
        scale = gamma * jax.lax.rsqrt(var + _EPS)
        shift = beta - mean * scale
        return y * scale + shift

    y1 = conv3x3(x, m1_ref)
    y1 = jnp.maximum(bn_fold(y1, g1_ref[...], b1_ref[...]), 0.0)
    y2 = conv3x3(y1, m2_ref)
    y2 = bn_fold(y2, g2_ref[...], b2_ref[...])
    out_ref[...] = jnp.maximum(y2 + x, 0.0)


# ------------------------------ host-side helpers -----------------------------

def _conv3x3_row_matrices(w, width):
    """Fold the kw taps + 'same' zero-padding along W into per-kh band matrices.

    w: (3, 3, Cin, Cout)  ->  (3, width*Cin, width*Cout) f32 with
    M[kh][w'*Cin + cin, w*Cout + co] = w[kh, w'-w+1, cin, co] if |w'-w| <= 1.
    """
    _, _, cin, cout = w.shape
    wp = jnp.arange(width)[:, None]          # input column  w'
    wo = jnp.arange(width)[None, :]          # output column w
    kw = wp - wo + 1                          # (width, width)
    valid = ((kw >= 0) & (kw <= 2)).astype(w.dtype)
    taps = w[:, jnp.clip(kw, 0, 2), :, :]     # (3, width, width, Cin, Cout)
    taps = taps * valid[None, :, :, None, None]
    taps = jnp.transpose(taps, (0, 1, 3, 2, 4))   # (kh, w', cin, w, cout)
    return taps.reshape(3, width * cin, width * cout).astype(jnp.float32)


# --------------------------------- wrapper -----------------------------------

@jax.jit
def basic_block_forward(x_nchw, w1, g1, b1, w2, g2, b2):
    """BasicBlock forward. x_nchw: (N, C, H, W) f32; conv weights (3,3,Cin,Cout)."""
    N, C, H, W = x_nchw.shape
    planes = w1.shape[-1]
    WC = W * planes

    # NCHW -> NHWC -> lane-dense flat (N*H, W*C)   (row-major, free reshape)
    x = jnp.transpose(x_nchw, (0, 2, 3, 1)).astype(jnp.float32)
    x_flat = x.reshape(N * H, W * C)

    # Banded per-kh conv matrices (kw + zero padding along W folded in).
    m1 = _conv3x3_row_matrices(w1.astype(jnp.float32), W)
    m2 = _conv3x3_row_matrices(w2.astype(jnp.float32), W)

    # Per-lane gamma/beta (lane j holds channel j % C).
    g1f = jnp.tile(g1.astype(jnp.float32), W).reshape(1, WC)
    b1f = jnp.tile(b1.astype(jnp.float32), W).reshape(1, WC)
    g2f = jnp.tile(g2.astype(jnp.float32), W).reshape(1, WC)
    b2f = jnp.tile(b2.astype(jnp.float32), W).reshape(1, WC)

    # Same-channel-lane 0/1 matrix for per-channel BN stats.
    lane_c = jnp.arange(WC, dtype=jnp.int32) % planes
    a_mat = (lane_c[:, None] == lane_c[None, :]).astype(jnp.float32)

    # H-boundary masks (zero the shifted row-tap on image-edge rows).
    hh = jnp.arange(N * H, dtype=jnp.int32) % H
    nt = jnp.broadcast_to((hh != 0).astype(jnp.float32)[:, None], (N * H, WC))
    nb = jnp.broadcast_to((hh != (H - 1)).astype(jnp.float32)[:, None], (N * H, WC))

    vmem = pl.BlockSpec(memory_space=pltpu.MemorySpace.VMEM)
    kernel = functools.partial(_basic_block_kernel, 1.0 / float(N * H * W))

    out_flat = pl.pallas_call(
        kernel,
        out_shape=jax.ShapeDtypeStruct((N * H, WC), jnp.float32),
        in_specs=[vmem] * 10,
        out_specs=vmem,
    )(x_flat, nt, nb, m1, g1f, b1f, m2, g2f, b2f, a_mat)

    return jnp.transpose(out_flat.reshape(N, H, W, planes), (0, 3, 1, 2))


# ------------------------------ pure-JAX reference ----------------------------

def _ref_conv3x3(x_nchw, w_khkwio):
    w_oihw = jnp.transpose(w_khkwio, (3, 2, 0, 1))
    return jax.lax.conv_general_dilated(
        x_nchw, w_oihw, window_strides=(1, 1), padding=((1, 1), (1, 1)),
        dimension_numbers=("NCHW", "OIHW", "NCHW"))


def _ref_bn(x_nchw, gamma, beta):
    mean = jnp.mean(x_nchw, axis=(0, 2, 3), keepdims=True)
    var = jnp.mean(jnp.square(x_nchw - mean), axis=(0, 2, 3), keepdims=True)
    g = gamma.reshape(1, -1, 1, 1)
    b = beta.reshape(1, -1, 1, 1)
    return (x_nchw - mean) * jax.lax.rsqrt(var + _EPS) * g + b


def basic_block_reference(x_nchw, w1, g1, b1, w2, g2, b2):
    out = jnp.maximum(_ref_bn(_ref_conv3x3(x_nchw, w1), g1, b1), 0.0)
    out = _ref_bn(_ref_conv3x3(out, w2), g2, b2)
    return jnp.maximum(out + x_nchw, 0.0)


# ----------------------------------- main -------------------------------------

if __name__ == "__main__":
    key = jax.random.PRNGKey(0)
    k_x, k_w1, k_w2, k_g1, k_b1, k_g2, k_b2 = jax.random.split(key, 7)

    N, C, H, W = 2, 4, 16, 16       # inplanes = planes = 4, stride = 1
    planes = C

    x = jax.random.normal(k_x, (N, C, H, W), jnp.float32)

    # deterministic synthetic parameters (conv3x3 has no bias)
    w1 = 0.1 * jax.random.normal(k_w1, (3, 3, C, planes), jnp.float32)
    w2 = 0.1 * jax.random.normal(k_w2, (3, 3, planes, planes), jnp.float32)
    g1 = 1.0 + 0.1 * jax.random.normal(k_g1, (planes,), jnp.float32)
    b1 = 0.1 * jax.random.normal(k_b1, (planes,), jnp.float32)
    g2 = 1.0 + 0.1 * jax.random.normal(k_g2, (planes,), jnp.float32)
    b2 = 0.1 * jax.random.normal(k_b2, (planes,), jnp.float32)

    out = basic_block_forward(x, w1, g1, b1, w2, g2, b2)
    out = jax.block_until_ready(out)

    ref = basic_block_reference(x, w1, g1, b1, w2, g2, b2)
    assert out.shape == (N, C, H, W)
    # All-f32 path now; tolerance kept generous to absorb MXU/conv precision
    # policy differences between the Pallas matmuls and lax.conv.
    assert jnp.allclose(out, ref, rtol=2e-2, atol=5e-2), "mismatch vs reference"

    print("KERNEL_OK")
</pallas_src>

<mosaic_0001>
module attributes {stable_mosaic.version = 11 : i64} {
  func.func @_basic_block_kernel(%arg0: memref<32x64xf32, #tpu.memory_space<vmem>>, %arg1: memref<32x64xf32, #tpu.memory_space<vmem>>, %arg2: memref<32x64xf32, #tpu.memory_space<vmem>>, %arg3: memref<3x64x64xf32, #tpu.memory_space<vmem>>, %arg4: memref<1x64xf32, #tpu.memory_space<vmem>>, %arg5: memref<1x64xf32, #tpu.memory_space<vmem>>, %arg6: memref<3x64x64xf32, #tpu.memory_space<vmem>>, %arg7: memref<1x64xf32, #tpu.memory_space<vmem>>, %arg8: memref<1x64xf32, #tpu.memory_space<vmem>>, %arg9: memref<64x64xf32, #tpu.memory_space<vmem>>, %arg10: memref<32x64xf32, #tpu.memory_space<vmem>>) attributes {dimension_semantics = [], scalar_prefetch = 0 : i64, scratch_operands = 0 : i64, tpu.core_type = #tpu.core_type<tc>} {
    %c0 = arith.constant 0 : index
    %c0_0 = arith.constant 0 : index
    %0 = vector.load %arg0[%c0, %c0_0] : memref<32x64xf32, #tpu.memory_space<vmem>>, vector<32x64xf32>
    %c0_1 = arith.constant 0 : index
    %c0_2 = arith.constant 0 : index
    %1 = vector.load %arg1[%c0_1, %c0_2] : memref<32x64xf32, #tpu.memory_space<vmem>>, vector<32x64xf32>
    %c0_3 = arith.constant 0 : index
    %c0_4 = arith.constant 0 : index
    %2 = vector.load %arg2[%c0_3, %c0_4] : memref<32x64xf32, #tpu.memory_space<vmem>>, vector<32x64xf32>
    %c0_5 = arith.constant 0 : index
    %c0_6 = arith.constant 0 : index
    %3 = vector.load %arg9[%c0_5, %c0_6] : memref<64x64xf32, #tpu.memory_space<vmem>>, vector<64x64xf32>
    %cst = arith.constant 0.000000e+00 : f32
    %4 = vector.broadcast %cst : f32 to vector<1x64xf32>
    %5 = vector.extract_strided_slice %0 {offsets = [0, 0], sizes = [31, 64], strides = [1, 1]} : vector<32x64xf32> to vector<31x64xf32>
    %6 = tpu.concatenate %4, %5 in 0 : vector<1x64xf32>, vector<31x64xf32> -> vector<32x64xf32>
    %7 = arith.mulf %6, %1 : vector<32x64xf32>
    %8 = vector.extract_strided_slice %0 {offsets = [1, 0], sizes = [31, 64], strides = [1, 1]} : vector<32x64xf32> to vector<31x64xf32>
    %9 = tpu.concatenate %8, %4 in 0 : vector<31x64xf32>, vector<1x64xf32> -> vector<32x64xf32>
    %10 = arith.mulf %9, %2 : vector<32x64xf32>
    %c0_7 = arith.constant 0 : index
    %c0_8 = arith.constant 0 : index
    %c0_9 = arith.constant 0 : index
    %11 = vector.load %arg3[%c0_7, %c0_8, %c0_9] : memref<3x64x64xf32, #tpu.memory_space<vmem>>, vector<1x64x64xf32>
    %12 = vector.shape_cast %11 : vector<1x64x64xf32> to vector<64x64xf32>
    %cst_10 = arith.constant dense<0.000000e+00> : vector<32x64xf32>
    %13 = tpu.matmul %7, %12, %cst_10 {dimension_numbers = #tpu.dot_dimension_numbers<[1], [0], [0], [1], [0, 0, 1, 1], [], []>} : vector<32x64xf32>, vector<64x64xf32>, vector<32x64xf32> -> vector<32x64xf32>
    %c1 = arith.constant 1 : index
    %c0_11 = arith.constant 0 : index
    %c0_12 = arith.constant 0 : index
    %14 = vector.load %arg3[%c1, %c0_11, %c0_12] : memref<3x64x64xf32, #tpu.memory_space<vmem>>, vector<1x64x64xf32>
    %15 = vector.shape_cast %14 : vector<1x64x64xf32> to vector<64x64xf32>
    %cst_13 = arith.constant dense<0.000000e+00> : vector<32x64xf32>
    %16 = tpu.matmul %0, %15, %cst_13 {dimension_numbers = #tpu.dot_dimension_numbers<[1], [0], [0], [1], [0, 0, 1, 1], [], []>} : vector<32x64xf32>, vector<64x64xf32>, vector<32x64xf32> -> vector<32x64xf32>
    %17 = arith.addf %13, %16 : vector<32x64xf32>
    %c2 = arith.constant 2 : index
    %c0_14 = arith.constant 0 : index
    %c0_15 = arith.constant 0 : index
    %18 = vector.load %arg3[%c2, %c0_14, %c0_15] : memref<3x64x64xf32, #tpu.memory_space<vmem>>, vector<1x64x64xf32>
    %19 = vector.shape_cast %18 : vector<1x64x64xf32> to vector<64x64xf32>
    %cst_16 = arith.constant dense<0.000000e+00> : vector<32x64xf32>
    %20 = tpu.matmul %10, %19, %cst_16 {dimension_numbers = #tpu.dot_dimension_numbers<[1], [0], [0], [1], [0, 0, 1, 1], [], []>} : vector<32x64xf32>, vector<64x64xf32>, vector<32x64xf32> -> vector<32x64xf32>
    %21 = arith.addf %17, %20 : vector<32x64xf32>
    %c0_17 = arith.constant 0 : index
    %c0_18 = arith.constant 0 : index
    %22 = vector.load %arg4[%c0_17, %c0_18] : memref<1x64xf32, #tpu.memory_space<vmem>>, vector<1x64xf32>
    %c0_19 = arith.constant 0 : index
    %c0_20 = arith.constant 0 : index
    %23 = vector.load %arg5[%c0_19, %c0_20] : memref<1x64xf32, #tpu.memory_space<vmem>>, vector<1x64xf32>
    %cst_21 = arith.constant dense<0.000000e+00> : vector<32x64xf32>
    %24 = tpu.matmul %21, %3, %cst_21 {dimension_numbers = #tpu.dot_dimension_numbers<[1], [0], [0], [1], [0, 0, 1, 1], [], []>} : vector<32x64xf32>, vector<64x64xf32>, vector<32x64xf32> -> vector<32x64xf32>
    %cst_22 = arith.constant dense<0.000000e+00> : vector<64xf32>
    %25 = vector.multi_reduction <add>, %24, %cst_22 [0] : vector<32x64xf32> to vector<64xf32>
    %26 = vector.shape_cast %25 : vector<64xf32> to vector<1x64xf32>
    %27 = arith.mulf %21, %21 : vector<32x64xf32>
    %cst_23 = arith.constant dense<0.000000e+00> : vector<32x64xf32>
    %28 = tpu.matmul %27, %3, %cst_23 {dimension_numbers = #tpu.dot_dimension_numbers<[1], [0], [0], [1], [0, 0, 1, 1], [], []>} : vector<32x64xf32>, vector<64x64xf32>, vector<32x64xf32> -> vector<32x64xf32>
    %cst_24 = arith.constant dense<0.000000e+00> : vector<64xf32>
    %29 = vector.multi_reduction <add>, %28, %cst_24 [0] : vector<32x64xf32> to vector<64xf32>
    %30 = vector.shape_cast %29 : vector<64xf32> to vector<1x64xf32>
    %cst_25 = arith.constant 0.001953125 : f32
    %31 = vector.broadcast %cst_25 : f32 to vector<1x64xf32>
    %32 = arith.mulf %26, %31 : vector<1x64xf32>
    %cst_26 = arith.constant 0.001953125 : f32
    %33 = vector.broadcast %cst_26 : f32 to vector<1x64xf32>
    %34 = arith.mulf %30, %33 : vector<1x64xf32>
    %35 = arith.mulf %32, %32 : vector<1x64xf32>
    %36 = arith.subf %34, %35 : vector<1x64xf32>
    %cst_27 = arith.constant 9.99999974E-6 : f32
    %37 = vector.broadcast %cst_27 : f32 to vector<1x64xf32>
    %38 = arith.addf %36, %37 : vector<1x64xf32>
    %39 = math.rsqrt %38 : vector<1x64xf32>
    %40 = arith.mulf %22, %39 : vector<1x64xf32>
    %41 = arith.mulf %32, %40 : vector<1x64xf32>
    %42 = arith.subf %23, %41 : vector<1x64xf32>
    %43 = vector.broadcast %40 : vector<1x64xf32> to vector<32x64xf32>
    %44 = arith.mulf %21, %43 : vector<32x64xf32>
    %45 = vector.broadcast %42 : vector<1x64xf32> to vector<32x64xf32>
    %46 = arith.addf %44, %45 : vector<32x64xf32>
    %cst_28 = arith.constant 0.000000e+00 : f32
    %47 = vector.broadcast %cst_28 : f32 to vector<32x64xf32>
    %48 = arith.maximumf %46, %47 : vector<32x64xf32>
    %cst_29 = arith.constant 0.000000e+00 : f32
    %49 = vector.broadcast %cst_29 : f32 to vector<1x64xf32>
    %50 = vector.extract_strided_slice %48 {offsets = [0, 0], sizes = [31, 64], strides = [1, 1]} : vector<32x64xf32> to vector<31x64xf32>
    %51 = tpu.concatenate %49, %50 in 0 : vector<1x64xf32>, vector<31x64xf32> -> vector<32x64xf32>
    %52 = arith.mulf %51, %1 : vector<32x64xf32>
    %53 = vector.extract_strided_slice %48 {offsets = [1, 0], sizes = [31, 64], strides = [1, 1]} : vector<32x64xf32> to vector<31x64xf32>
    %54 = tpu.concatenate %53, %49 in 0 : vector<31x64xf32>, vector<1x64xf32> -> vector<32x64xf32>
    %55 = arith.mulf %54, %2 : vector<32x64xf32>
    %c0_30 = arith.constant 0 : index
    %c0_31 = arith.constant 0 : index
    %c0_32 = arith.constant 0 : index
    %56 = vector.load %arg6[%c0_30, %c0_31, %c0_32] : memref<3x64x64xf32, #tpu.memory_space<vmem>>, vector<1x64x64xf32>
    %57 = vector.shape_cast %56 : vector<1x64x64xf32> to vector<64x64xf32>
    %cst_33 = arith.constant dense<0.000000e+00> : vector<32x64xf32>
    %58 = tpu.matmul %52, %57, %cst_33 {dimension_numbers = #tpu.dot_dimension_numbers<[1], [0], [0], [1], [0, 0, 1, 1], [], []>} : vector<32x64xf32>, vector<64x64xf32>, vector<32x64xf32> -> vector<32x64xf32>
    %c1_34 = arith.constant 1 : index
    %c0_35 = arith.constant 0 : index
    %c0_36 = arith.constant 0 : index
    %59 = vector.load %arg6[%c1_34, %c0_35, %c0_36] : memref<3x64x64xf32, #tpu.memory_space<vmem>>, vector<1x64x64xf32>
    %60 = vector.shape_cast %59 : vector<1x64x64xf32> to vector<64x64xf32>
    %cst_37 = arith.constant dense<0.000000e+00> : vector<32x64xf32>
    %61 = tpu.matmul %48, %60, %cst_37 {dimension_numbers = #tpu.dot_dimension_numbers<[1], [0], [0], [1], [0, 0, 1, 1], [], []>} : vector<32x64xf32>, vector<64x64xf32>, vector<32x64xf32> -> vector<32x64xf32>
    %62 = arith.addf %58, %61 : vector<32x64xf32>
    %c2_38 = arith.constant 2 : index
    %c0_39 = arith.constant 0 : index
    %c0_40 = arith.constant 0 : index
    %63 = vector.load %arg6[%c2_38, %c0_39, %c0_40] : memref<3x64x64xf32, #tpu.memory_space<vmem>>, vector<1x64x64xf32>
    %64 = vector.shape_cast %63 : vector<1x64x64xf32> to vector<64x64xf32>
    %cst_41 = arith.constant dense<0.000000e+00> : vector<32x64xf32>
    %65 = tpu.matmul %55, %64, %cst_41 {dimension_numbers = #tpu.dot_dimension_numbers<[1], [0], [0], [1], [0, 0, 1, 1], [], []>} : vector<32x64xf32>, vector<64x64xf32>, vector<32x64xf32> -> vector<32x64xf32>
    %66 = arith.addf %62, %65 : vector<32x64xf32>
    %c0_42 = arith.constant 0 : index
    %c0_43 = arith.constant 0 : index
    %67 = vector.load %arg7[%c0_42, %c0_43] : memref<1x64xf32, #tpu.memory_space<vmem>>, vector<1x64xf32>
    %c0_44 = arith.constant 0 : index
    %c0_45 = arith.constant 0 : index
    %68 = vector.load %arg8[%c0_44, %c0_45] : memref<1x64xf32, #tpu.memory_space<vmem>>, vector<1x64xf32>
    %cst_46 = arith.constant dense<0.000000e+00> : vector<32x64xf32>
    %69 = tpu.matmul %66, %3, %cst_46 {dimension_numbers = #tpu.dot_dimension_numbers<[1], [0], [0], [1], [0, 0, 1, 1], [], []>} : vector<32x64xf32>, vector<64x64xf32>, vector<32x64xf32> -> vector<32x64xf32>
    %cst_47 = arith.constant dense<0.000000e+00> : vector<64xf32>
    %70 = vector.multi_reduction <add>, %69, %cst_47 [0] : vector<32x64xf32> to vector<64xf32>
    %71 = vector.shape_cast %70 : vector<64xf32> to vector<1x64xf32>
    %72 = arith.mulf %66, %66 : vector<32x64xf32>
    %cst_48 = arith.constant dense<0.000000e+00> : vector<32x64xf32>
    %73 = tpu.matmul %72, %3, %cst_48 {dimension_numbers = #tpu.dot_dimension_numbers<[1], [0], [0], [1], [0, 0, 1, 1], [], []>} : vector<32x64xf32>, vector<64x64xf32>, vector<32x64xf32> -> vector<32x64xf32>
    %cst_49 = arith.constant dense<0.000000e+00> : vector<64xf32>
    %74 = vector.multi_reduction <add>, %73, %cst_49 [0] : vector<32x64xf32> to vector<64xf32>
    %75 = vector.shape_cast %74 : vector<64xf32> to vector<1x64xf32>
    %cst_50 = arith.constant 0.001953125 : f32
    %76 = vector.broadcast %cst_50 : f32 to vector<1x64xf32>
    %77 = arith.mulf %71, %76 : vector<1x64xf32>
    %cst_51 = arith.constant 0.001953125 : f32
    %78 = vector.broadcast %cst_51 : f32 to vector<1x64xf32>
    %79 = arith.mulf %75, %78 : vector<1x64xf32>
    %80 = arith.mulf %77, %77 : vector<1x64xf32>
    %81 = arith.subf %79, %80 : vector<1x64xf32>
    %cst_52 = arith.constant 9.99999974E-6 : f32
    %82 = vector.broadcast %cst_52 : f32 to vector<1x64xf32>
    %83 = arith.addf %81, %82 : vector<1x64xf32>
    %84 = math.rsqrt %83 : vector<1x64xf32>
    %85 = arith.mulf %67, %84 : vector<1x64xf32>
    %86 = arith.mulf %77, %85 : vector<1x64xf32>
    %87 = arith.subf %68, %86 : vector<1x64xf32>
    %88 = vector.broadcast %85 : vector<1x64xf32> to vector<32x64xf32>
    %89 = arith.mulf %66, %88 : vector<32x64xf32>
    %90 = vector.broadcast %87 : vector<1x64xf32> to vector<32x64xf32>
    %91 = arith.addf %89, %90 : vector<32x64xf32>
    %92 = arith.addf %91, %0 : vector<32x64xf32>
    %cst_53 = arith.constant 0.000000e+00 : f32
    %93 = vector.broadcast %cst_53 : f32 to vector<32x64xf32>
    %94 = arith.maximumf %92, %93 : vector<32x64xf32>
    %c0_54 = arith.constant 0 : index
    %c0_55 = arith.constant 0 : index
    %95 = vector.load %arg10[%c0_54, %c0_55] : memref<32x64xf32, #tpu.memory_space<vmem>>, vector<32x64xf32>
    tpu.vector_store %arg10[%c0_54, %c0_55], %94 {strides = array<i32>} : memref<32x64xf32, #tpu.memory_space<vmem>>, vector<32x64xf32>,
    return
  }
}

</mosaic_0001>

<bundles_post_ra>
// kernel: tile.23
= control target key start
LH: loop header
LB: loop body
LE: loop exit
PB: predicated region body
PF: predicated region fallthrough
CT: control target
= control target key end

     0   :  { %s28_s0 = inlined_call_operand.vmem [shape: f32[4], index: 0, kind: input, shape index: {}]   ;;  %s29_s1 = inlined_call_operand.vmem [shape: f32[16,4], index: 1, kind: output, shape index: {}]  }
   0x1   :  { %v4_v0 = vld [vmem:[%s28_s0] ss:$0 sm:$0xff] }
   0x2   :  { %5 = vst [vmem:[%s29_s1] sm:$0xff] %v4_v0  ;;  %8 = vst [vmem:[%s29_s1 + $0x8] sm:$0xff] %v4_v0 }

// kernel: tile.24
= control target key start
LH: loop header
LB: loop body
LE: loop exit
PB: predicated region body
PF: predicated region fallthrough
CT: control target
= control target key end

     0   :  { %s131_s10 = smov 60   ;;  %s132_s11 = smov 52   ;;  %vm3_vm0 = vcmask 31744   ;;  %vm9_vm1 = vcmask 523744   ;;  %vm15_vm2 = vcmask 490944   ;;  %vm21_vm3 = vcmask 458144   ;;  %s207_s0 = inlined_call_operand.vmem [shape: f32[16,4], index: 0, kind: input, shape index: {}]   ;;  %s208_s1 = inlined_call_operand.vmem [shape: f32[1,64], index: 1, kind: output, shape index: {}]  }
   0x1   :  { %v101_v0 = vld [vmem:[%s207_s0 + $0xf] sm:$0x1]   ;;  %v103_v1 = vld [vmem:[%s207_s0 + $0xd] sm:$0x1]   ;;  %v102_v2 = vld [vmem:[%s207_s0 + $0xe] sm:$0x1]  }
   0x2   :  { %7 = vrot.lane.b32.xlu0 %v101_v0, %s131_s10  ;;  %19 = vrot.lane.b32.xlu1 %v103_v1, %s132_s11  ;;  %v104_v3 = vld [vmem:[%s207_s0 + $0xc] sm:$0x1]   ;;  %s133_s16 = smov 56   ;;  %s134_s17 = smov 48   ;;  %v105_v4 = vld [vmem:[%s207_s0 + $0xb] sm:$0x1]  }
   0x3   :  { %v106_v5 = vld [vmem:[%s207_s0 + $0xa] sm:$0x1]   ;;  %v2_v6 = vld [vmem:[%s207_s0] sm:$0x1]   ;;  %s135_s24 = smov 44   ;;  %s136_s25 = smov 40  }
   0x4   :  { %4 = vst.msk [vmem:[#allocation0] sm:$0x1] %vm3_vm0, %v2_v6   ;;  %v107_v7 = vld [vmem:[%s207_s0 + $0x9] sm:$0x1]   ;;  %v108_v8 = vld [vmem:[%s207_s0 + $0x8] sm:$0x1]  }
   0x5   :  { %s137_s30 = smov 36   ;;  %s138_s2 = smov 32   ;;  %v109_v9 = vld [vmem:[%s207_s0 + $0x7] sm:$0x1]   ;;  %v110_v10 = vld [vmem:[%s207_s0 + $0x6] sm:$0x1]  }
   0x6   :  { %13 = vrot.lane.b32.xlu0 %v102_v2, %s133_s16  ;;  %25 = vrot.lane.b32.xlu1 %v104_v3, %s134_s17  ;;  %s139_s7 = smov 28   ;;  %s140_s8 = smov 24   ;;  %v111_v11 = vld [vmem:[%s207_s0 + $0x5] sm:$0x1]   ;;  %v112_v12 = vld [vmem:[%s207_s0 + $0x4] sm:$0x1]  }
   0x7   :  { %s141_s13 = smov 20   ;;  %s142_s14 = smov 16   ;;  %v113_v13 = vld [vmem:[%s207_s0 + $0x3] sm:$0x1]   ;;  %v114_v14 = vld [vmem:[%s207_s0 + $0x2] sm:$0x1]  }
   0x8   :  { %s143_s19 = smov 12   ;;  %s144_s20 = smov 8   ;;  %v115_v15 = vld [vmem:[%s207_s0 + $0x1] sm:$0x1]   ;;  %vm27_vm4 = vcmask 425344   ;;  %vm33_vm5 = vcmask 392544  }
   0x9   :  { %s145_s0 = smov 4   ;;  %vm39_vm6 = vcmask 359744   ;;  %vm45_vm7 = vcmask 326944   ;;  %vm51_vm8 = vcmask 294144   ;;  %vm57_vm9 = vcmask 261344  }
   0xa   :  { %31 = vrot.lane.b32.xlu0 %v105_v4, %s135_s24  ;;  %37 = vrot.lane.b32.xlu1 %v106_v5, %s136_s25  ;;  %vm63_vm10 = vcmask 228544   ;;  %vm69_vm11 = vcmask 195744   ;;  %vm75_vm12 = vcmask 162944   ;;  %vm81_vm13 = vcmask 130144  }
   0xb   :  { %vm87_vm14 = vcmask 97344   ;;  %vm93_vm15 = vcmask 64544  }
   0xe   :  { %43 = vrot.lane.b32.xlu0 %v107_v7, %s137_s30  ;;  %49 = vrot.lane.b32.xlu1 %v108_v8, %s138_s2 }
  0x12   :  { %55 = vrot.lane.b32.xlu0 %v109_v9, %s139_s7  ;;  %61 = vrot.lane.b32.xlu1 %v110_v10, %s140_s8 }
  0x16   :  { %67 = vrot.lane.b32.xlu0 %v111_v11, %s141_s13  ;;  %73 = vrot.lane.b32.xlu1 %v112_v12, %s142_s14 }
  0x1a   :  { %79 = vrot.lane.b32.xlu0 %v113_v13, %s143_s19  ;;  %85 = vrot.lane.b32.xlu1 %v114_v14, %s144_s20 }
  0x1e   :  { %91 = vrot.lane.b32.xlu0 %v115_v15, %s145_s0 }
  0x74   :  { %v8_v16 = vpop.permute.xlu0 %7   ;;  %v20_v17 = vpop.permute.xlu1 %19  }
  0x75   :  { %10 = vst.msk [vmem:[#allocation0] sm:$0x1] %vm9_vm1, %v8_v16  }
  0x78   :  { %v14_v18 = vpop.permute.xlu0 %13   ;;  %v26_v19 = vpop.permute.xlu1 %25  }
  0x79   :  { %16 = vst.msk [vmem:[#allocation0] sm:$0x1] %vm15_vm2, %v14_v18  }
  0x7a   :  { %22 = vst.msk [vmem:[#allocation0] sm:$0x1] %vm21_vm3, %v20_v17  }
  0x7b   :  { %28 = vst.msk [vmem:[#allocation0] sm:$0x1] %vm27_vm4, %v26_v19  }
  0x7c   :  { %v32_v20 = vpop.permute.xlu0 %31   ;;  %v38_v21 = vpop.permute.xlu1 %37  }
  0x7d   :  { %34 = vst.msk [vmem:[#allocation0] sm:$0x1] %vm33_vm5, %v32_v20  }
  0x7e   :  { %40 = vst.msk [vmem:[#allocation0] sm:$0x1] %vm39_vm6, %v38_v21  }
  0x80   :  { %v44_v22 = vpop.permute.xlu0 %43   ;;  %v50_v23 = vpop.permute.xlu1 %49  }
  0x81   :  { %46 = vst.msk [vmem:[#allocation0] sm:$0x1] %vm45_vm7, %v44_v22  }
  0x82   :  { %52 = vst.msk [vmem:[#allocation0] sm:$0x1] %vm51_vm8, %v50_v23  }
  0x84   :  { %v56_v24 = vpop.permute.xlu0 %55   ;;  %v62_v25 = vpop.permute.xlu1 %61  }
  0x85   :  { %58 = vst.msk [vmem:[#allocation0] sm:$0x1] %vm57_vm9, %v56_v24  }
  0x86   :  { %64 = vst.msk [vmem:[#allocation0] sm:$0x1] %vm63_vm10, %v62_v25  }
  0x88   :  { %v68_v26 = vpop.permute.xlu0 %67   ;;  %v74_v27 = vpop.permute.xlu1 %73  }
  0x89   :  { %70 = vst.msk [vmem:[#allocation0] sm:$0x1] %vm69_vm11, %v68_v26  }
  0x8a   :  { %76 = vst.msk [vmem:[#allocation0] sm:$0x1] %vm75_vm12, %v74_v27  }
  0x8c   :  { %v80_v28 = vpop.permute.xlu0 %79   ;;  %v86_v29 = vpop.permute.xlu1 %85  }
  0x8d   :  { %82 = vst.msk [vmem:[#allocation0] sm:$0x1] %vm81_vm13, %v80_v28  }
  0x8e   :  { %88 = vst.msk [vmem:[#allocation0] sm:$0x1] %vm87_vm14, %v86_v29  }
  0x90   :  { %v92_v30 = vpop.permute.xlu0 %91  }
  0x91   :  { %94 = vst.msk [vmem:[#allocation0] sm:$0x1] %vm93_vm15, %v92_v30  }
  0x98   :  { %v98_v31 = vld [vmem:[#allocation0] sm:$0x1] }
  0x99   :  { %100 = vst [vmem:[%s208_s1] sm:$0x1] %v98_v31 }

// kernel: basic_block_forward.1
= control target key start
LH: loop header
LB: loop body
LE: loop exit
PB: predicated region body
PF: predicated region fallthrough
CT: control target
= control target key end

     0   :  { %vm110_vm0 = vcmask 523264   ;;  %vm59_vm1 = vcmask 1040384   ;;  %vm76_vm2 = vcmask 1046528   ;;  %s2404_s3 = inlined_call_operand.vmem [shape: f32[3,64,64], index: 3, kind: input, shape index: {}]   ;;  %s2405_s0 = inlined_call_operand.vmem [shape: f32[32,64], index: 0, kind: input, shape index: {}]   ;;  %s2406_s9 = inlined_call_operand.vmem [shape: f32[64,64], index: 9, kind: input, shape index: {}]   ;;  %s2407_s1 = inlined_call_operand.vmem [shape: f32[32,64], index: 1, kind: input, shape index: {}]   ;;  %s2408_s2 = inlined_call_operand.vmem [shape: f32[32,64], index: 2, kind: input, shape index: {}]   ;;  %s2409_s6 = inlined_call_operand.vmem [shape: f32[3,64,64], index: 6, kind: input, shape index: {}]   ;;  %s2410_s4 = inlined_call_operand.vmem [shape: f32[1,64], index: 4, kind: input, shape index: {}]   ;;  %s2411_s5 = inlined_call_operand.vmem [shape: f32[1,64], index: 5, kind: input, shape index: {}]   ;;  %s2412_s7 = inlined_call_operand.vmem [shape: f32[1,64], index: 7, kind: input, shape index: {}]   ;;  %s2413_s8 = inlined_call_operand.vmem [shape: f32[1,64], index: 8, kind: input, shape index: {}]   ;;  %s2414_s10 = inlined_call_operand.vmem [shape: f32[32,64], index: 10, kind: output, shape index: {}]  }
   0x1   :  { %v1294_v0 = vld [vmem:[%s2404_s3 + $0x40] sm:$0xff]  ;;  %v1295_v1 = vld [vmem:[%s2404_s3 + $0x48] sm:$0xff]  ;;  %v1296_v2 = vld [vmem:[%s2404_s3 + $0x50] sm:$0xff] }
   0x2   :  { %v1706_v3 = vpack.c.bf16 %v1295_v1, %v1294_v0  ;;  %v1297_v4 = vld [vmem:[%s2404_s3 + $0x58] sm:$0xff]  ;;  %v1298_v6 = vld [vmem:[%s2404_s3 + $0x60] sm:$0xff]  ;;  %v1299_v7 = vld [vmem:[%s2404_s3 + $0x68] sm:$0xff] }
   0x3   :  { %v1710_v5 = vpack.c.bf16 %v1297_v4, %v1296_v2  ;;  %v1962_v8 = vld [vmem:[%s2405_s0] sm:$0xff]  ;;  %v1714_v9 = vpack.c.bf16 %v1299_v7, %v1298_v6  ;;  %v1300_v10 = vld [vmem:[%s2404_s3 + $0x70] sm:$0xff]  ;;  %v1301_v11 = vld [vmem:[%s2404_s3 + $0x78] sm:$0xff] }
   0x4   :  { %1707 = vmatprep.subr.bf16.mxu0 %v1706_v3  ;;  %1502 = vmatprep.mubr.msk.f32.mxu0 %vm110_vm0, %v1962_v8  ;;  %v1718_v12 = vpack.c.bf16 %v1301_v11, %v1300_v10  ;;  %v93_v13 = vld [vmem:[%s2404_s3] sm:$0xff]  ;;  %v94_v14 = vld [vmem:[%s2404_s3 + $0x8] sm:$0xff]  ;;  %v49_v17 = vld [vmem:[%s2406_s9 + $0x10] sm:$0xff]  ;;  %v60_v18 = vrot.slane %v1962_v8, 7  ;;  %v77_v51 = vrot.slane %v1962_v8, 1 }
   0x5   :  { %1709 = vmatpush3.bf16.msra.mxu0 %v1706_v3  ;;  %v47_v15 = vld [vmem:[%s2406_s9] sm:$0xff]  ;;  %v48_v16 = vld [vmem:[%s2406_s9 + $0x8] sm:$0xff]  ;;  %v1722_v19 = vpack.c.bf16 %v94_v14, %v93_v13  ;;  %v50_v21 = vld [vmem:[%s2406_s9 + $0x18] sm:$0xff] }
   0x6   :  { %1711 = vmatprep.subr.bf16.mxu0 %v1710_v5  ;;  %v1988_v20 = vpack.c.bf16 %v48_v16, %v47_v15  ;;  %v95_v22 = vld [vmem:[%s2404_s3 + $0x10] sm:$0xff]  ;;  %v96_v23 = vld [vmem:[%s2404_s3 + $0x18] sm:$0xff]  ;;  %v1999_v24 = vpack.c.bf16 %v50_v21, %v49_v17  ;;  %v51_v25 = vld [vmem:[%s2406_s9 + $0x20] sm:$0xff]  ;;  %v71_v31 = vsel %vm59_vm1, 0.0, %v60_v18 }
   0x7   :  { %v52_v26 = vld [vmem:[%s2406_s9 + $0x28] sm:$0xff]  ;;  %v1726_v28 = vpack.c.bf16 %v96_v23, %v95_v22  ;;  %v2017_v29 = vld [vmem:[%s2405_s0 + $0x10] sm:$0xff]  ;;  %v2022_v30 = vld [vmem:[%s2407_s1] sm:$0xff] }
   0x8   :  { %1755 = vmatprep.subr.bf16.mxu1 %v1988_v20  ;;  %v2011_v27 = vld [vmem:[%s2405_s0 + $0x8] sm:$0xff]  ;;  %v97_v32 = vld [vmem:[%s2404_s3 + $0x20] sm:$0xff]  ;;  %v2032_v34 = vpack.c.bf16 %v52_v26, %v51_v25  ;;  %v53_v35 = vld [vmem:[%s2406_s9 + $0x30] sm:$0xff]  ;;  %v72_v38 = vmul.f32 %v71_v31, %v2022_v30  ;;  %v63_v44 = vrot.slane %v2017_v29, 7 }
   0x9   :  { %1713 = vmatpush3.bf16.msra.mxu0 %v1710_v5  ;;  %1757 = vmatpush3.bf16.msra.mxu1 %v1988_v20  ;;  %v98_v33 = vld [vmem:[%s2404_s3 + $0x28] sm:$0xff]  ;;  %v54_v36 = vld [vmem:[%s2406_s9 + $0x38] sm:$0xff]  ;;  %v99_v40 = vld [vmem:[%s2404_s3 + $0x30] sm:$0xff]  ;;  %v61_v43 = vrot.slane %v2011_v27, 7  ;;  %v78_v52 = vrot.slane %v2011_v27, 1 }
   0xa   :  { %1715 = vmatprep.subr.bf16.mxu0 %v1714_v9  ;;  %1759 = vmatprep.subr.bf16.mxu1 %v1999_v24  ;;  %v2047_v37 = vld [vmem:[%s2405_s0 + $0x18] sm:$0xff]  ;;  %v1730_v39 = vpack.c.bf16 %v98_v33, %v97_v32  ;;  %v2058_v42 = vpack.c.bf16 %v54_v36, %v53_v35  ;;  %v1310_v46 = vld [vmem:[%s2404_s3 + $0x80] sm:$0xff]  ;;  %v1311_v47 = vld [vmem:[%s2404_s3 + $0x88] sm:$0xff] }
   0xb   :  { %v100_v41 = vld [vmem:[%s2404_s3 + $0x38] sm:$0xff]  ;;  %v62_v48 = vsel %vm59_vm1, %v60_v18, %v61_v43  ;;  %v65_v49 = vrot.slane %v2047_v37, 7  ;;  %v2078_v50 = vld [vmem:[%s2407_s1 + $0x8] sm:$0xff]  ;;  %v1738_v53 = vpack.c.bf16 %v1311_v47, %v1310_v46  ;;  %v2085_v54 = vld [vmem:[%s2407_s1 + $0x10] sm:$0xff]  ;;  %v64_v55 = vsel %vm59_vm1, %v61_v43, %v63_v44 }
   0xc   :  { %v1734_v45 = vpack.c.bf16 %v100_v41, %v99_v40  ;;  %v1312_v56 = vld [vmem:[%s2404_s3 + $0x90] sm:$0xff]  ;;  %v1313_v57 = vld [vmem:[%s2404_s3 + $0x98] sm:$0xff]  ;;  %v73_v58 = vmul.f32 %v62_v48, %v2078_v50  ;;  %v74_v59 = vmul.f32 %v64_v55, %v2085_v54  ;;  %v2107_v63 = vld [vmem:[%s2408_s2] sm:$0xff]  ;;  %v79_v0 = vsel %vm76_vm2, %v77_v51, %v78_v52 }
   0xd   :  { %1717 = vmatpush3.bf16.msra.mxu0 %v1714_v9  ;;  %1761 = vmatpush3.bf16.msra.mxu1 %v1999_v24  ;;  %v2101_v60 = vld [vmem:[%s2407_s1 + $0x18] sm:$0xff]  ;;  %v66_v61 = vsel %vm59_vm1, %v63_v44, %v65_v49  ;;  %v1742_v62 = vpack.c.bf16 %v1313_v57, %v1312_v56  ;;  %v1314_v1 = vld [vmem:[%s2404_s3 + $0xa0] sm:$0xff]  ;;  %v1315_v2 = vld [vmem:[%s2404_s3 + $0xa8] sm:$0xff]  ;;  %v89_v4 = vmul.f32 %v79_v0, %v2107_v63  ;;  %v80_v9 = vrot.slane %v2017_v29, 1 }
   0xe   :  { %1719 = vmatprep.subr.bf16.mxu0 %v1718_v12  ;;  %1763 = vmatprep.subr.bf16.mxu1 %v2032_v34  ;;  %v75_v3 = vmul.f32 %v66_v61, %v2101_v60  ;;  %v1746_v5 = vpack.c.bf16 %v1315_v2, %v1314_v1  ;;  %v1316_v6 = vld [vmem:[%s2404_s3 + $0xb0] sm:$0xff]  ;;  %v1317_v7 = vld [vmem:[%s2404_s3 + $0xb8] sm:$0xff]  ;;  %v82_v10 = vrot.slane %v2047_v37, 1  ;;  %v2134_v13 = vld [vmem:[%s2408_s2 + $0x8] sm:$0xff] }
   0xf   :  { %v1750_v11 = vpack.c.bf16 %v1317_v7, %v1316_v6  ;;  %v2139_v14 = vld [vmem:[%s2408_s2 + $0x10] sm:$0xff]  ;;  %v2147_v18 = vld [vmem:[%s2408_s2 + $0x18] sm:$0xff]  ;;  %v1330_v35 = vld [vmem:[%s2409_s6 + $0x40] sm:$0xff] }
  0x10   :  { %v83_v15 = vsel %vm76_vm2, %v80_v9, %v82_v10  ;;  %v1331_v36 = vld [vmem:[%s2409_s6 + $0x48] sm:$0xff]  ;;  %v1333_v40 = vld [vmem:[%s2409_s6 + $0x58] sm:$0xff]  ;;  %v1334_v43 = vld [vmem:[%s2409_s6 + $0x60] sm:$0xff] }
  0x11   :  { %1721 = vmatpush3.bf16.msra.mxu0 %v1718_v12  ;;  %1765 = vmatpush3.bf16.msra.mxu1 %v2032_v34  ;;  %v81_v12 = vsel %vm76_vm2, %v78_v52, %v80_v9  ;;  %v91_v17 = vmul.f32 %v83_v15, %v2139_v14  ;;  %v1335_v44 = vld [vmem:[%s2409_s6 + $0x68] sm:$0xff]  ;;  %v1336_v46 = vld [vmem:[%s2409_s6 + $0x70] sm:$0xff]  ;;  %v1337_v47 = vld [vmem:[%s2409_s6 + $0x78] sm:$0xff] }
  0x12   :  { %1723 = vmatprep.subr.bf16.mxu0 %v1722_v19  ;;  %1767 = vmatprep.subr.bf16.mxu1 %v2058_v42  ;;  %v90_v16 = vmul.f32 %v81_v12, %v2134_v13  ;;  %v1798_v48 = vpack.c.bf16 %v1337_v47, %v1336_v46  ;;  %v706_v49 = vld [vmem:[%s2409_s6] sm:$0xff]  ;;  %v707_v51 = vld [vmem:[%s2409_s6 + $0x8] sm:$0xff]  ;;  %v647_v47 = vlaneseq }
  0x13   :  { %v2228_v52 = vpack.c.bf16 %v707_v51, %v706_v49  ;;  %v411_v49 = vld [vmem:[%s2410_s4] sm:$0x1] }
  0x14   :  { %1503 = vmatmul.mubr.msk.f32.vlgmr.msra.gmra.mrb[0].mxu0 %vm110_vm0, %v2011_v27 }
  0x15   :  { %1725 = vmatpush3.bf16.msra.mxu0 %v1722_v19  ;;  %1505 = vmatprep.mubr.msk.f32.mxu0 %vm110_vm0, %v2017_v29  ;;  %v88_v19 = vsel %vm76_vm2, %v82_v10, 0.0 }
  0x16   :  { %1727 = vmatprep.subr.bf16.mxu0 %v1726_v28  ;;  %1769 = vmatpush3.bf16.msra.mxu1 %v2058_v42  ;;  %v92_v21 = vmul.f32 %v88_v19, %v2147_v18 }
  0x17   :  { %1771 = vmatprep.subr.bf16.mxu1 %v1988_v20 }
  0x18   :  { %1506 = vmatmul.mubr.msk.f32.gmra.mrb[2].mxu0 %vm110_vm0, %v2047_v37 }
  0x19   :  { %1729 = vmatpush3.bf16.msra.mxu0 %v1726_v28  ;;  %1524 = vmatprep.mubr.msk.f32.mxu0 %vm110_vm0, %v72_v38  ;;  %v1332_v38 = vld [vmem:[%s2409_s6 + $0x50] sm:$0xff] }
  0x1a   :  { %1731 = vmatprep.subr.bf16.mxu0 %v1730_v39  ;;  %v1790_v41 = vpack.c.bf16 %v1333_v40, %v1332_v38 }
  0x1d   :  { %1733 = vmatpush3.bf16.msra.mxu0 %v1730_v39  ;;  %v1786_v39 = vpack.c.bf16 %v1331_v36, %v1330_v35 }
  0x1e   :  { %1735 = vmatprep.subr.bf16.mxu0 %v1734_v45 }
  0x21   :  { %1737 = vmatpush3.bf16.msra.mxu0 %v1734_v45  ;;  %v1794_v45 = vpack.c.bf16 %v1335_v44, %v1334_v43 }
  0x22   :  { %1739 = vmatprep.subr.bf16.mxu0 %v1738_v53 }
  0x24   :  { %1525 = vmatmul.mubr.msk.f32.vlgmr.msra.gmra.mrb[0].mxu0 %vm110_vm0, %v73_v58 }
  0x25   :  { %1741 = vmatpush3.bf16.msra.mxu0 %v1738_v53  ;;  %1527 = vmatprep.mubr.msk.f32.mxu0 %vm110_vm0, %v74_v59 }
  0x26   :  { %1743 = vmatprep.subr.bf16.mxu0 %v1742_v62 }
  0x28   :  { %1528 = vmatmul.mubr.msk.f32.gmra.mrb[2].mxu0 %vm110_vm0, %v75_v3 }
  0x29   :  { %1745 = vmatpush3.bf16.msra.mxu0 %v1742_v62  ;;  %1546 = vmatprep.mubr.msk.f32.mxu0 %vm110_vm0, %v89_v4 }
  0x2a   :  { %1747 = vmatprep.subr.bf16.mxu0 %v1746_v5 }
  0x2d   :  { %1749 = vmatpush3.bf16.msra.mxu0 %v1746_v5 }
  0x2e   :  { %1751 = vmatprep.subr.bf16.mxu0 %v1750_v11 }
  0x31   :  { %1753 = vmatpush3.bf16.msra.mxu0 %v1750_v11 }
  0x32   :  { %1835 = vmatprep.subr.bf16.mxu0 %v1988_v20 }
  0x34   :  { %1547 = vmatmul.mubr.msk.f32.vlgmr.msra.gmra.mrb[0].mxu0 %vm110_vm0, %v90_v16 }
  0x35   :  { %1549 = vmatprep.mubr.msk.f32.mxu0 %vm110_vm0, %v91_v17  ;;  %1837 = vmatpush3.bf16.msra.mxu0 %v1988_v20 }
  0x36   :  { %1839 = vmatprep.subr.bf16.mxu0 %v1999_v24 }
  0x38   :  { %1550 = vmatmul.mubr.msk.f32.gmra.mrb[2].mxu0 %vm110_vm0, %v92_v21 }
  0x39   :  { %1841 = vmatpush3.bf16.msra.mxu0 %v1999_v24 }
  0x3a   :  { %1843 = vmatprep.subr.bf16.mxu0 %v2032_v34 }
  0x3d   :  { %1845 = vmatpush3.bf16.msra.mxu0 %v2032_v34 }
  0x3e   :  { %1847 = vmatprep.subr.bf16.mxu0 %v2058_v42 }
  0x41   :  { %1849 = vmatpush3.bf16.msra.mxu0 %v2058_v42 }
  0x42   :  { %1851 = vmatprep.subr.bf16.mxu0 %v1988_v20 }
 0x107   :  { %v2163_v22 = vpop.f32.mrb[0].mxu0 }
 0x108   :  { %v2165_v23 = vpop.f32.mrb[1].mxu0  ;;  %v524_v31 = vmul.f32 %v2163_v22, %v2163_v22 }
 0x109   :  { %1568 = vmatprep.mubr.msk.f32.mxu1 %vm110_vm0, %v2165_v23  ;;  %v523_v28 = vmul.f32 %v2165_v23, %v2165_v23 }
 0x10a   :  { %1569 = vmatmul.mubr.msk.f32.vlgmr.msra.gmra.mrb[0].mxu1 %vm110_vm0, %v2163_v22 }
 0x10b   :  { %1773 = vmatpush3.bf16.msra.mxu1 %v1988_v20  ;;  %v2172_v25 = vpop.f32.mrb[2].mxu0 }
 0x10c   :  { %v2174_v26 = vpop.f32.mrb[3].mxu0  ;;  %1775 = vmatprep.subr.bf16.mxu1 %v1999_v24  ;;  %v526_v33 = vmul.f32 %v2172_v25, %v2172_v25 }
 0x10d   :  { %1571 = vmatprep.mubr.msk.f32.mxu1 %vm110_vm0, %v2174_v26  ;;  %v525_v32 = vmul.f32 %v2174_v26, %v2174_v26 }
 0x10e   :  { %1572 = vmatmul.mubr.msk.f32.gmra.mrb[2].mxu1 %vm110_vm0, %v2172_v25 }
 0x10f   :  { %1777 = vmatpush3.bf16.msra.mxu1 %v1999_v24  ;;  %1590 = vmatprep.mubr.msk.f32.mxu1 %vm110_vm0, %v523_v28 }
 0x110   :  { %1779 = vmatprep.subr.bf16.mxu1 %v2032_v34 }
 0x113   :  { %1781 = vmatpush3.bf16.msra.mxu1 %v2032_v34 }
 0x114   :  { %1783 = vmatprep.subr.bf16.mxu1 %v2058_v42 }
 0x117   :  { %1785 = vmatpush3.bf16.msra.mxu1 %v2058_v42 }
 0x118   :  { %1787 = vmatprep.subr.bf16.mxu1 %v1786_v39 }
 0x11a   :  { %1591 = vmatmul.mubr.msk.f32.vlgmr.msra.gmra.mrb[4].mxu1 %vm110_vm0, %v524_v31 }
 0x11b   :  { %1593 = vmatprep.mubr.msk.f32.mxu1 %vm110_vm0, %v525_v32  ;;  %1789 = vmatpush3.bf16.msra.mxu1 %v1786_v39 }
 0x11c   :  { %1791 = vmatprep.subr.bf16.mxu1 %v1790_v41 }
 0x11e   :  { %1594 = vmatmul.mubr.msk.f32.gmra.mrb[6].mxu1 %vm110_vm0, %v526_v33 }
 0x11f   :  { %1793 = vmatpush3.bf16.msra.mxu1 %v1790_v41 }
 0x120   :  { %1795 = vmatprep.subr.bf16.mxu1 %v1794_v45 }
 0x123   :  { %1797 = vmatpush3.bf16.msra.mxu1 %v1794_v45 }
 0x124   :  { %1799 = vmatprep.subr.bf16.mxu1 %v1798_v48 }
 0x127   :  { %1801 = vmatpush3.bf16.msra.mxu1 %v1798_v48  ;;  %v648_v48 = vshrl.u32 %v647_v47, 7  ;;  %v1347_v47 = vld [vmem:[%s2409_s6 + $0x88] sm:$0xff] }
 0x128   :  { %1803 = vmatprep.subr.bf16.mxu1 %v2228_v52 }
 0x129   :  { %v2242_v51 = vsub.s32 0, %v648_v48 }
 0x1dd   :  { %v1570_v53 = vpop.f32.mrb[0].mxu1 }
 0x1de   :  { %v511_v55 = vsel %vm110_vm0, %v1570_v53, 0.0  ;;  %v491_v56 = vpop.f32.mrb[1].mxu1 }
 0x1df   :  { %v510_v57 = vsel %vm110_vm0, %v491_v56, 0.0  ;;  %v412_v56 = vld [vmem:[%s2411_s5] sm:$0x1] }
 0x1e0   :  { %v512_v58 = vadd.f32 %v511_v55, %v510_v57 }
 0x1e1   :  { %v1573_v59 = vpop.f32.mrb[2].mxu1 }
 0x1e2   :  { %v501_v61 = vpop.f32.mrb[3].mxu1  ;;  %v515_v1 = vsel %vm110_vm0, %v1573_v59, 0.0 }
 0x1e3   :  { %v513_v62 = vsel %vm110_vm0, %v501_v61, 0.0 }
 0x1e4   :  { %v514_v0 = vadd.f32 %v513_v62, %v512_v58 }
 0x1e6   :  { %v516_v2 = vadd.f32 %v515_v1, %v514_v0 }
 0x1e8   :  { %v517_v3 = vrot.slane %v516_v2, 4 }
 0x1ea   :  { %v518_v4 = vadd.f32 %v517_v3, %v516_v2 }
 0x1ec   :  { %v519_v10 = vrot.slane %v518_v4, 2 }
 0x1ed   :  { %v1592_v5 = vpop.f32.mrb[4].mxu1 }
 0x1ee   :  { %v625_v6 = vsel %vm110_vm0, %v1592_v5, 0.0  ;;  %v605_v7 = vpop.f32.mrb[5].mxu1  ;;  %v520_v17 = vadd.f32 %v519_v10, %v518_v4 }
 0x1ef   :  { %v624_v9 = vsel %vm110_vm0, %v605_v7, 0.0  ;;  %v709_v7 = vld [vmem:[%s2409_s6 + $0x18] sm:$0xff] }
 0x1f0   :  { %v626_v11 = vadd.f32 %v625_v6, %v624_v9  ;;  %v521_v31 = vrot.slane %v520_v17, 1  ;;  %v708_v6 = vld [vmem:[%s2409_s6 + $0x10] sm:$0xff] }
 0x1f1   :  { %v1595_v12 = vpop.f32.mrb[6].mxu1 }
 0x1f2   :  { %v615_v15 = vpop.f32.mrb[7].mxu1  ;;  %v629_v21 = vsel %vm110_vm0, %v1595_v12, 0.0  ;;  %v522_v35 = vadd.f32 %v521_v31, %v520_v17  ;;  %v710_v17 = vld [vmem:[%s2409_s6 + $0x20] sm:$0xff] }
 0x1f3   :  { %v627_v16 = vsel %vm110_vm0, %v615_v15, 0.0 }
 0x1f4   :  { %v628_v19 = vadd.f32 %v627_v16, %v626_v11  ;;  %v637_v39 = vmul.f32 0.001953125, %v522_v35 }
 0x1f6   :  { %v630_v28 = vadd.f32 %v629_v21, %v628_v19  ;;  %v639_v43 = vmul.f32 %v637_v39, %v637_v39  ;;  %v711_v19 = vld [vmem:[%s2409_s6 + $0x28] sm:$0xff] }
 0x1f8   :  { %v631_v32 = vrot.slane %v630_v28, 4 }
 0x1fa   :  { %v632_v33 = vadd.f32 %v631_v32, %v630_v28 }
 0x1fc   :  { %v633_v36 = vrot.slane %v632_v33, 2 }
 0x1fe   :  { %v634_v38 = vadd.f32 %v633_v36, %v632_v33 }
 0x200   :  { %v635_v40 = vrot.slane %v634_v38, 1 }
 0x202   :  { %v636_v41 = vadd.f32 %v635_v40, %v634_v38  ;;  %v1810_v38 = vpack.c.bf16 %v711_v19, %v710_v17 }
 0x204   :  { %v638_v44 = vmul.f32 0.001953125, %v636_v41  ;;  %v712_v41 = vld [vmem:[%s2409_s6 + $0x30] sm:$0xff] }
 0x206   :  { %v640_v45 = vsub.f32 %v638_v44, %v639_v43 }
 0x208   :  { %v641_v46 = vadd.f32 1e-05, %v640_v45 }
 0x20a   :  { %1882 = vrsqrt.f32 %v641_v46  ;;  %v1346_v46 = vld [vmem:[%s2409_s6 + $0x80] sm:$0xff] }
 0x20b   :  { %v1818_v48 = vpack.c.bf16 %v1347_v47, %v1346_v46 }
 0x214   :  { %v1883_v53 = vpop.eup %1882 }
 0x215   :  { %v643_v55 = vmul.f32 %v1883_v53, %v411_v49  ;;  %v1348_v49 = vld [vmem:[%s2409_s6 + $0x90] sm:$0xff]  ;;  %v1349_v53 = vld [vmem:[%s2409_s6 + $0x98] sm:$0xff] }
 0x217   :  { %v644_v57 = vmul.f32 %v643_v55, %v637_v39  ;;  %v650_v58 = vrot.slane %v643_v55, %v2242_v51 }
 0x219   :  { %v645_v59 = vsub.f32 %v412_v56, %v644_v57  ;;  %v652_v61 = vmul.f32 %v650_v58, %v2165_v23  ;;  %v653_v62 = vmul.f32 %v2163_v22, %v650_v58  ;;  %v654_v0 = vmul.f32 %v650_v58, %v2174_v26 }
 0x21a   :  { %v655_v1 = vmul.f32 %v2172_v25, %v650_v58  ;;  %v1806_v25 = vpack.c.bf16 %v709_v7, %v708_v6  ;;  %v1822_v56 = vpack.c.bf16 %v1349_v53, %v1348_v49  ;;  %v1350_v58 = vld [vmem:[%s2409_s6 + $0xa0] sm:$0xff] }
 0x21b   :  { %v660_v2 = vrot.slane %v645_v59, %v2242_v51  ;;  %v1351_v59 = vld [vmem:[%s2409_s6 + $0xa8] sm:$0xff] }
 0x21d   :  { %v662_v3 = vadd.f32 %v660_v2, %v652_v61  ;;  %v663_v4 = vadd.f32 %v660_v2, %v653_v62  ;;  %v664_v5 = vadd.f32 %v660_v2, %v654_v0  ;;  %v665_v23 = vadd.f32 %v660_v2, %v655_v1  ;;  %v1353_v0 = vld [vmem:[%s2409_s6 + $0xb8] sm:$0xff] }
 0x21f   :  { %v666_v9 = vmax.f32 %v662_v3, 0.0  ;;  %v667_v22 = vmax.f32 %v663_v4, 0.0  ;;  %v668_v10 = vmax.f32 %v664_v5, 0.0  ;;  %v2259_v26 = vmax.f32 %v665_v23, 0.0 }
 0x221   :  { %v690_v11 = vrot.slane %v666_v9, 1  ;;  %1612 = vmatprep.mubr.msk.f32.mxu1 %vm110_vm0, %v666_v9  ;;  %v677_v12 = vrot.slane %v668_v10, 7  ;;  %v693_v15 = vrot.slane %v668_v10, 1  ;;  %v679_v16 = vrot.slane %v2259_v26, 7 }
 0x222   :  { %1613 = vmatmul.mubr.msk.f32.vlgmr.msra.gmra.mrb[8].mxu1 %vm110_vm0, %v667_v22  ;;  %v695_v21 = vrot.slane %v2259_v26, 1  ;;  %v674_v28 = vrot.slane %v666_v9, 7  ;;  %v675_v31 = vrot.slane %v667_v22, 7  ;;  %v691_v32 = vrot.slane %v667_v22, 1 }
 0x223   :  { %1805 = vmatpush3.bf16.msra.mxu1 %v2228_v52  ;;  %1615 = vmatprep.mubr.msk.f32.mxu1 %vm110_vm0, %v668_v10  ;;  %v680_v33 = vsel %vm59_vm1, %v677_v12, %v679_v16  ;;  %v713_v52 = vld [vmem:[%s2409_s6 + $0x38] sm:$0xff] }
 0x224   :  { %1807 = vmatprep.subr.bf16.mxu1 %v1806_v25  ;;  %v676_v35 = vsel %vm59_vm1, %v674_v28, %v675_v31  ;;  %v685_v36 = vsel %vm59_vm1, 0.0, %v674_v28  ;;  %v678_v39 = vsel %vm59_vm1, %v675_v31, %v677_v12  ;;  %v692_v43 = vsel %vm76_vm2, %v690_v11, %v691_v32 }
 0x225   :  { %v686_v40 = vmul.f32 %v685_v36, %v2022_v30  ;;  %v694_v44 = vsel %vm76_vm2, %v691_v32, %v693_v15  ;;  %v696_v45 = vsel %vm76_vm2, %v693_v15, %v695_v21  ;;  %v1814_v30 = vpack.c.bf16 %v713_v52, %v712_v41 }
 0x226   :  { %1616 = vmatmul.mubr.msk.f32.gmra.mrb[10].mxu1 %vm110_vm0, %v2259_v26  ;;  %v687_v55 = vmul.f32 %v676_v35, %v2078_v50  ;;  %v688_v57 = vmul.f32 %v678_v39, %v2085_v54  ;;  %v689_v61 = vmul.f32 %v680_v33, %v2101_v60  ;;  %v1826_v50 = vpack.c.bf16 %v1351_v59, %v1350_v58  ;;  %v1352_v54 = vld [vmem:[%s2409_s6 + $0xb0] sm:$0xff]  ;;  %v1023_v58 = vld [vmem:[%s2412_s7] sm:$0x1] }
 0x227   :  { %1809 = vmatpush3.bf16.msra.mxu1 %v1806_v25  ;;  %1634 = vmatprep.mubr.msk.f32.mxu1 %vm110_vm0, %v686_v40  ;;  %v702_v62 = vmul.f32 %v692_v43, %v2107_v63  ;;  %v1830_v1 = vpack.c.bf16 %v1353_v0, %v1352_v54  ;;  %v703_v60 = vmul.f32 %v694_v44, %v2134_v13  ;;  %v701_v2 = vsel %vm76_vm2, %v695_v21, 0.0 }
 0x228   :  { %1811 = vmatprep.subr.bf16.mxu1 %v1810_v38  ;;  %v704_v63 = vmul.f32 %v696_v45, %v2139_v14  ;;  %v705_v3 = vmul.f32 %v701_v2, %v2147_v18 }
 0x22b   :  { %1813 = vmatpush3.bf16.msra.mxu1 %v1810_v38 }
 0x22c   :  { %1815 = vmatprep.subr.bf16.mxu1 %v1814_v30 }
 0x22f   :  { %1817 = vmatpush3.bf16.msra.mxu1 %v1814_v30 }
 0x230   :  { %1819 = vmatprep.subr.bf16.mxu1 %v1818_v48 }
 0x232   :  { %1635 = vmatmul.mubr.msk.f32.vlgmr.msra.gmra.mrb[8].mxu1 %vm110_vm0, %v687_v55 }
 0x233   :  { %1637 = vmatprep.mubr.msk.f32.mxu1 %vm110_vm0, %v688_v57  ;;  %1821 = vmatpush3.bf16.msra.mxu1 %v1818_v48 }
 0x234   :  { %1823 = vmatprep.subr.bf16.mxu1 %v1822_v56 }
 0x236   :  { %1638 = vmatmul.mubr.msk.f32.gmra.mrb[10].mxu1 %vm110_vm0, %v689_v61 }
 0x237   :  { %1825 = vmatpush3.bf16.msra.mxu1 %v1822_v56  ;;  %1656 = vmatprep.mubr.msk.f32.mxu1 %vm110_vm0, %v702_v62 }
 0x238   :  { %1827 = vmatprep.subr.bf16.mxu1 %v1826_v50 }
 0x23b   :  { %1829 = vmatpush3.bf16.msra.mxu1 %v1826_v50  ;;  %v1024_v50 = vld [vmem:[%s2413_s8] sm:$0x1] }
 0x23c   :  { %1831 = vmatprep.subr.bf16.mxu1 %v1830_v1 }
 0x23f   :  { %1833 = vmatpush3.bf16.msra.mxu1 %v1830_v1 }
 0x242   :  { %1657 = vmatmul.mubr.msk.f32.vlgmr.msra.gmra.mrb[8].mxu1 %vm110_vm0, %v703_v60 }
 0x243   :  { %1659 = vmatprep.mubr.msk.f32.mxu1 %vm110_vm0, %v704_v63 }
 0x246   :  { %1660 = vmatmul.mubr.msk.f32.gmra.mrb[10].mxu1 %vm110_vm0, %v705_v3 }
 0x315   :  { %v2329_v4 = vpop.f32.mrb[8].mxu1 }
 0x316   :  { %v2331_v5 = vpop.f32.mrb[9].mxu1 }
 0x317   :  { %1678 = vmatprep.mubr.msk.f32.mxu0 %vm110_vm0, %v2331_v5  ;;  %v1135_v18 = vmul.f32 %v2331_v5, %v2331_v5 }
 0x318   :  { %1679 = vmatmul.mubr.msk.f32.vlgmr.msra.gmra.mrb[4].mxu0 %vm110_vm0, %v2329_v4 }
 0x319   :  { %1853 = vmatpush3.bf16.msra.mxu0 %v1988_v20  ;;  %v2338_v13 = vpop.f32.mrb[10].mxu1  ;;  %v1136_v20 = vmul.f32 %v2329_v4, %v2329_v4 }
 0x31a   :  { %v2340_v14 = vpop.f32.mrb[11].mxu1  ;;  %1855 = vmatprep.subr.bf16.mxu0 %v1999_v24 }
 0x31b   :  { %1681 = vmatprep.mubr.msk.f32.mxu0 %vm110_vm0, %v2340_v14  ;;  %v1137_v6 = vmul.f32 %v2340_v14, %v2340_v14 }
 0x31c   :  { %1682 = vmatmul.mubr.msk.f32.gmra.mrb[6].mxu0 %vm110_vm0, %v2338_v13 }
 0x31d   :  { %1857 = vmatpush3.bf16.msra.mxu0 %v1999_v24  ;;  %1700 = vmatprep.mubr.msk.f32.mxu0 %vm110_vm0, %v1135_v18  ;;  %v1138_v24 = vmul.f32 %v2338_v13, %v2338_v13 }
 0x31e   :  { %1859 = vmatprep.subr.bf16.mxu0 %v2032_v34 }
 0x321   :  { %1861 = vmatpush3.bf16.msra.mxu0 %v2032_v34 }
 0x322   :  { %1863 = vmatprep.subr.bf16.mxu0 %v2058_v42 }
 0x325   :  { %1865 = vmatpush3.bf16.msra.mxu0 %v2058_v42 }
 0x328   :  { %1701 = vmatmul.mubr.msk.f32.vlgmr.msra.gmra.mrb[8].mxu0 %vm110_vm0, %v1136_v20 }
 0x329   :  { %1703 = vmatprep.mubr.msk.f32.mxu0 %vm110_vm0, %v1137_v6 }
 0x32c   :  { %1704 = vmatmul.mubr.msk.f32.gmra.mrb[10].mxu0 %vm110_vm0, %v1138_v24 }
 0x3eb   :  { %v1680_v34 = vpop.f32.mrb[4].mxu0 }
 0x3ec   :  { %v1123_v7 = vsel %vm110_vm0, %v1680_v34, 0.0  ;;  %v1103_v23 = vpop.f32.mrb[5].mxu0 }
 0x3ed   :  { %v1122_v42 = vsel %vm110_vm0, %v1103_v23, 0.0 }
 0x3ee   :  { %v1124_v9 = vadd.f32 %v1123_v7, %v1122_v42 }
 0x3ef   :  { %v1683_v22 = vpop.f32.mrb[6].mxu0 }
 0x3f0   :  { %v1113_v10 = vpop.f32.mrb[7].mxu0  ;;  %v1127_v11 = vsel %vm110_vm0, %v1683_v22, 0.0 }
 0x3f1   :  { %v1125_v26 = vsel %vm110_vm0, %v1113_v10, 0.0 }
 0x3f2   :  { %v1126_v25 = vadd.f32 %v1125_v26, %v1124_v9 }
 0x3f4   :  { %v1128_v12 = vadd.f32 %v1127_v11, %v1126_v25 }
 0x3f6   :  { %v1129_v15 = vrot.slane %v1128_v12, 4 }
 0x3f8   :  { %v1130_v16 = vadd.f32 %v1129_v15, %v1128_v12 }
 0x3fa   :  { %v1131_v31 = vrot.slane %v1130_v16, 2 }
 0x3fb   :  { %v1702_v17 = vpop.f32.mrb[8].mxu0 }
 0x3fc   :  { %v1237_v19 = vsel %vm110_vm0, %v1702_v17, 0.0  ;;  %v1217_v21 = vpop.f32.mrb[9].mxu0  ;;  %v1132_v38 = vadd.f32 %v1131_v31, %v1130_v16 }
 0x3fd   :  { %v1236_v28 = vsel %vm110_vm0, %v1217_v21, 0.0 }
 0x3fe   :  { %v1238_v32 = vadd.f32 %v1237_v19, %v1236_v28  ;;  %v1133_v52 = vrot.slane %v1132_v38, 1 }
 0x3ff   :  { %v1705_v33 = vpop.f32.mrb[10].mxu0 }
 0x400   :  { %v1227_v35 = vpop.f32.mrb[11].mxu0  ;;  %v1241_v40 = vsel %vm110_vm0, %v1705_v33, 0.0  ;;  %v1134_v45 = vadd.f32 %v1133_v52, %v1132_v38 }
 0x401   :  { %v1239_v36 = vsel %vm110_vm0, %v1227_v35, 0.0 }
 0x402   :  { %v1240_v39 = vadd.f32 %v1239_v36, %v1238_v32  ;;  %v1249_v47 = vmul.f32 0.001953125, %v1134_v45 }
 0x404   :  { %v1242_v41 = vadd.f32 %v1241_v40, %v1240_v39  ;;  %v1251_v53 = vmul.f32 %v1249_v47, %v1249_v47 }
 0x406   :  { %v1243_v43 = vrot.slane %v1242_v41, 4 }
 0x408   :  { %v1244_v44 = vadd.f32 %v1243_v43, %v1242_v41 }
 0x40a   :  { %v1245_v30 = vrot.slane %v1244_v44, 2 }
 0x40c   :  { %v1246_v46 = vadd.f32 %v1245_v30, %v1244_v44 }
 0x40e   :  { %v1247_v48 = vrot.slane %v1246_v46, 1 }
 0x410   :  { %v1248_v49 = vadd.f32 %v1247_v48, %v1246_v46 }
 0x412   :  { %v1250_v55 = vmul.f32 0.001953125, %v1248_v49 }
 0x414   :  { %v1252_v56 = vsub.f32 %v1250_v55, %v1251_v53 }
 0x416   :  { %v1253_v57 = vadd.f32 1e-05, %v1252_v56 }
 0x418   :  { %1884 = vrsqrt.f32 %v1253_v57 }
 0x422   :  { %v1885_v59 = vpop.eup %1884 }
 0x423   :  { %v1255_v61 = vmul.f32 %v1885_v59, %v1023_v58 }
 0x425   :  { %v1256_v62 = vmul.f32 %v1255_v61, %v1249_v47  ;;  %v1262_v54 = vrot.slane %v1255_v61, %v2242_v51 }
 0x427   :  { %v1257_v0 = vsub.f32 %v1024_v50, %v1256_v62  ;;  %v1264_v1 = vmul.f32 %v1262_v54, %v2331_v5  ;;  %v1265_v60 = vmul.f32 %v2329_v4, %v1262_v54  ;;  %v1266_v63 = vmul.f32 %v1262_v54, %v2340_v14 }
 0x428   :  { %v1267_v2 = vmul.f32 %v2338_v13, %v1262_v54 }
 0x429   :  { %v1272_v3 = vrot.slane %v1257_v0, %v2242_v51 }
 0x42b   :  { %v1274_v18 = vadd.f32 %v1272_v3, %v1264_v1  ;;  %v1275_v20 = vadd.f32 %v1272_v3, %v1265_v60  ;;  %v1276_v6 = vadd.f32 %v1272_v3, %v1266_v63  ;;  %v1277_v24 = vadd.f32 %v1272_v3, %v1267_v2 }
 0x42d   :  { %v1278_v34 = vadd.f32 %v1274_v18, %v1962_v8  ;;  %v1279_v7 = vadd.f32 %v1275_v20, %v2011_v27  ;;  %v1280_v23 = vadd.f32 %v1276_v6, %v2017_v29  ;;  %v1281_v5 = vadd.f32 %v1277_v24, %v2047_v37 }
 0x42f   :  { %v1282_v42 = vmax.f32 %v1278_v34, 0.0  ;;  %v1283_v4 = vmax.f32 %v1279_v7, 0.0  ;;  %v1284_v9 = vmax.f32 %v1280_v23, 0.0  ;;  %v1285_v14 = vmax.f32 %v1281_v5, 0.0 }
 0x431   :  { %1286 = vst.msk [vmem:[%s2414_s10] sm:$0xff] %vm110_vm0, %v1282_v42  ;;  %1287 = vst.msk [vmem:[%s2414_s10 + $0x8] sm:$0xff] %vm110_vm0, %v1283_v4 }
 0x432   :  { %1288 = vst.msk [vmem:[%s2414_s10 + $0x10] sm:$0xff] %vm110_vm0, %v1284_v9  ;;  %1289 = vst.msk [vmem:[%s2414_s10 + $0x18] sm:$0xff] %vm110_vm0, %v1285_v14 }

</bundles_post_ra>
